<compile_context>
chip_gen: v5e
topology: v5e:2x2
jax: 0.10.0
libtpu: 0.0.40
codegen_flags: <defaults>
</compile_context>

<pallas_src>
import functools
import math

import jax
import jax.numpy as jnp
from jax import lax
from jax.experimental import pallas as pl
from jax.experimental.pallas import tpu as pltpu


# ----------------------------------------------------------------------------
# Pallas kernel: one (batch, head, query-tile) grid step.
# ----------------------------------------------------------------------------
def global_pointer_kernel(x_ref, wq_ref, wk_ref, bq_ref, bk_ref,
                          cos_ref, sin_ref, out_ref, k_rope_ref, *,
                          tq, head_size, mxu_dtype):
    D = head_size
    qt = pl.program_id(2)                        # query-tile index (innermost)

    # --- keys for the whole sequence: once per (batch, head), cached ---------
    @pl.when(qt == 0)
    def _():
        cos = cos_ref[...]                       # (S, D) f32
        sin = sin_ref[...]
        # [Wk | Wk@R] per head -> (S, 2D) f32 accumulation on the MXU.
        hk = jnp.dot(x_ref[0], wk_ref[0],
                     preferred_element_type=jnp.float32) + bk_ref[0]
        # RoPE is purely elementwise (R already folded into the weight slab).
        k_rope_ref[...] = (hk[:, :D] * cos + hk[:, D:] * sin).astype(mxu_dtype)

    # --- queries: only the TQ rows of this tile -------------------------------
    row0 = pl.multiple_of(qt * tq, tq)
    x_q = x_ref[0, pl.ds(row0, tq), :]           # (TQ, H_in)
    hq = jnp.dot(x_q, wq_ref[0],                 # [s*Wq | s*Wq@R] per head
                 preferred_element_type=jnp.float32) + bq_ref[0]   # (TQ, 2D)
    cos_q = cos_ref[pl.ds(row0, tq), :]          # (TQ, D)
    sin_q = sin_ref[pl.ds(row0, tq), :]
    q_rope = (hq[:, :D] * cos_q + hq[:, D:] * sin_q).astype(mxu_dtype)

    # scores: contract D of q (dim 1) with D of cached k (dim 1) -> (TQ, S);
    # 1/sqrt(num_head) is already baked into the q columns.
    scores = lax.dot_general(q_rope, k_rope_ref[...],
                             (((1,), (1,)), ((), ())),
                             preferred_element_type=jnp.float32)
    out_ref[0, 0] = scores.astype(out_ref.dtype)


def _pick_vmem_limit():
    """128 MiB-VMEM chips (v5e/v6e) get a high limit; otherwise stay safe for v7x (64 MiB)."""
    try:
        kind = jax.devices()[0].device_kind.lower()
    except Exception:  # pragma: no cover
        kind = ""
    if "v5" in kind or "v6" in kind:
        return 100 * 1024 * 1024
    return 48 * 1024 * 1024


def global_pointer_pallas(hidden, W, bias, *, num_head, head_size, tq=None,
                          mxu_dtype=jnp.float32, out_dtype=jnp.float32):
    """hidden: (B, S, H_in) f32.  W: (H_in, num_head*2*head_size).  bias: (num_head*2*head_size,)."""
    B, S, H_in = hidden.shape
    D = head_size
    scale = 1.0 / math.sqrt(num_head)            # matches torch: / num_head ** 0.5

    if tq is None:
        tq = min(S, 256)
    assert S % tq == 0 and tq % 8 == 0, "TQ must divide S and be a multiple of 8"

    # Interleaved-pair rotation matrix: (x @ R)[2i] = -x[2i+1], (x @ R)[2i+1] = x[2i]
    idx = jnp.arange(D)
    R = jnp.zeros((D, D), jnp.float32)
    R = R.at[idx[1::2], idx[0::2]].set(-1.0)
    R = R.at[idx[0::2], idx[1::2]].set(1.0)

    # Split the big nn.Linear per head, fold R and the 1/sqrt(num_head) scale in.
    Wh = W.reshape(H_in, num_head, 2 * D)
    Wq, Wk = Wh[:, :, :D], Wh[:, :, D:]                         # (H_in, nh, D)
    WqR = jnp.einsum('ind,de->ine', Wq, R)
    WkR = jnp.einsum('ind,de->ine', Wk, R)
    wq_aug = jnp.transpose(jnp.concatenate([scale * Wq, scale * WqR], -1), (1, 0, 2))  # (nh, H_in, 2D)
    wk_aug = jnp.transpose(jnp.concatenate([Wk, WkR], -1), (1, 0, 2))                  # (nh, H_in, 2D)

    bh = bias.reshape(num_head, 2 * D)
    bq, bk = bh[:, :D], bh[:, D:]
    bq_aug = jnp.concatenate([scale * bq, scale * (bq @ R)], -1)[:, None, :]  # (nh, 1, 2D) f32
    bk_aug = jnp.concatenate([bk, bk @ R], -1)[:, None, :]                    # (nh, 1, 2D) f32

    # RoPE tables (interleaved-pair convention), per-head-size only: (S, D).
    pos = jnp.arange(S, dtype=jnp.float32)
    inv_freq = jnp.power(10000.0, -jnp.arange(0, D, 2, dtype=jnp.float32) / D)
    freqs = pos[:, None] * inv_freq[None, :]                    # (S, D/2)
    cos = jnp.repeat(jnp.cos(freqs), 2, axis=-1)                # (S, D)
    sin = jnp.repeat(jnp.sin(freqs), 2, axis=-1)

    # Cast MXU operands once in the wrapper (halves operand DMA bytes on the
    # bf16 path — valuable on every generation, incl. v5e's bf16-native MXU);
    # RoPE elementwise math stays f32 inside the kernel.
    x_in = hidden.astype(mxu_dtype)
    wq_in = wq_aug.astype(mxu_dtype)
    wk_in = wk_aug.astype(mxu_dtype)

    kernel = functools.partial(global_pointer_kernel, tq=tq, head_size=D,
                               mxu_dtype=mxu_dtype)

    return pl.pallas_call(
        kernel,
        out_shape=jax.ShapeDtypeStruct((B, num_head, S, S), out_dtype),
        grid_spec=pltpu.PrefetchScalarGridSpec(
            num_scalar_prefetch=0,
            grid=(B, num_head, S // tq),
            in_specs=[
                pl.BlockSpec((1, S, H_in), lambda b, h, q: (b, 0, 0)),      # hidden (full seq / batch)
                pl.BlockSpec((1, H_in, 2 * D), lambda b, h, q: (h, 0, 0)),  # per-head [s*Wq | s*WqR]
                pl.BlockSpec((1, H_in, 2 * D), lambda b, h, q: (h, 0, 0)),  # per-head [Wk | WkR]
                pl.BlockSpec((1, 1, 2 * D), lambda b, h, q: (h, 0, 0)),     # per-head q bias
                pl.BlockSpec((1, 1, 2 * D), lambda b, h, q: (h, 0, 0)),     # per-head k bias
                pl.BlockSpec((S, D), lambda b, h, q: (0, 0)),               # cos (S, D)
                pl.BlockSpec((S, D), lambda b, h, q: (0, 0)),               # sin (S, D)
            ],
            out_specs=pl.BlockSpec((1, 1, tq, S), lambda b, h, q: (b, h, q, 0)),
            scratch_shapes=[pltpu.VMEM((S, D), mxu_dtype)],                 # cached k_rope per (b, h)
        ),
        compiler_params=pltpu.CompilerParams(
            dimension_semantics=("parallel", "parallel", "arbitrary"),
            vmem_limit_bytes=_pick_vmem_limit(),
        ),
    )(x_in, wq_in, wk_in, bq_aug, bk_aug, cos, sin)


# ----------------------------------------------------------------------------
# Plain-JAX glue: deterministic BERT-embedding stand-in + reference check.
# ----------------------------------------------------------------------------
def bert_standin(params, input_ids, token_type_ids):
    # embedding lookup + LayerNorm (stand-in for BertModel sequence output)
    x = (params["tok_emb"][input_ids]
         + params["type_emb"][token_type_ids]
         + params["pos_emb"][None, :input_ids.shape[1], :])
    mu = x.mean(-1, keepdims=True)
    var = x.var(-1, keepdims=True)
    return (x - mu) / jnp.sqrt(var + 1e-12)


def global_pointer_reference(hidden, W, bias, *, num_head, head_size):
    """Pure-JAX reference mirroring torch GlobalPointer.forward (unfused)."""
    B, S, _ = hidden.shape
    D = head_size
    h = hidden @ W + bias
    h = h.reshape(B, S, num_head, 2 * D)
    qw, kw = h[..., :D], h[..., D:]

    pos = jnp.arange(S, dtype=jnp.float32)
    inv_freq = jnp.power(10000.0, -jnp.arange(0, D, 2, dtype=jnp.float32) / D)
    freqs = pos[:, None] * inv_freq[None, :]
    cos = jnp.repeat(jnp.cos(freqs), 2, axis=-1)[None, :, None, :]
    sin = jnp.repeat(jnp.sin(freqs), 2, axis=-1)[None, :, None, :]

    def rope(x):
        x2 = jnp.stack([-x[..., 1::2], x[..., 0::2]], axis=-1).reshape(x.shape)
        return x * cos + x2 * sin

    qw, kw = rope(qw), rope(kw)
    logits = jnp.einsum('bmhd,bnhd->bhmn', qw, kw)
    return logits / math.sqrt(num_head)          # matches torch: / num_head ** 0.5


if __name__ == "__main__":
    # small shapes, but large enough to exercise the query-tile grid axis
    B, S, H_in = 2, 128, 32
    num_head, head_size = 4, 16
    TQ = 64                                       # 2 query tiles per sequence
    vocab, n_types = 30, 2

    key = jax.random.PRNGKey(0)
    ks = jax.random.split(key, 8)

    params = {
        "tok_emb":  0.02 * jax.random.normal(ks[0], (vocab, H_in), jnp.float32),
        "type_emb": 0.02 * jax.random.normal(ks[1], (n_types, H_in), jnp.float32),
        "pos_emb":  0.02 * jax.random.normal(ks[2], (S, H_in), jnp.float32),
    }
    # GlobalPointer.projector = nn.Linear(H_in, num_head*head_size*2)
    W_proj = (1.0 / math.sqrt(H_in)) * jax.random.normal(
        ks[3], (H_in, num_head * head_size * 2), jnp.float32)
    b_proj = 0.01 * jax.random.normal(ks[4], (num_head * head_size * 2,), jnp.float32)

    features = {
        "input_ids":      jax.random.randint(ks[5], (B, S), 0, vocab),
        "token_type_ids": jax.random.randint(ks[6], (B, S), 0, n_types),
        "attention_mask": jnp.ones((B, S), jnp.int32),
    }

    # "BERT" sequence output (deterministic stand-in), then GlobalPointer head in Pallas
    hidden = bert_standin(params, features["input_ids"], features["token_type_ids"])
    ref = global_pointer_reference(hidden, W_proj, b_proj,
                                   num_head=num_head, head_size=head_size)

    # f32 MXU path, f32 logits: tight correctness check vs. pure-JAX reference.
    logits = global_pointer_pallas(hidden, W_proj, b_proj,
                                   num_head=num_head, head_size=head_size,
                                   tq=TQ, mxu_dtype=jnp.float32,
                                   out_dtype=jnp.float32)
    logits = jax.block_until_ready(logits)
    assert logits.shape == (B, num_head, S, S)
    assert jnp.allclose(logits, ref, atol=1e-4, rtol=1e-4), "f32 mismatch vs reference"

    # bf16 MXU operands + bf16 logits (writeback-halving fast path on all chips):
    # f32 accumulation, looser tolerance for bf16 rounding.
    logits_bf16 = global_pointer_pallas(hidden, W_proj, b_proj,
                                        num_head=num_head, head_size=head_size,
                                        tq=TQ, mxu_dtype=jnp.bfloat16,
                                        out_dtype=jnp.bfloat16)
    logits_bf16 = jax.block_until_ready(logits_bf16)
    assert logits_bf16.shape == (B, num_head, S, S)
    assert jnp.allclose(logits_bf16.astype(jnp.float32), ref,
                        atol=3e-1, rtol=5e-2), "bf16 mismatch vs reference"

    print("KERNEL_OK")
</pallas_src>

<mosaic_0001>
module attributes {stable_mosaic.version = 11 : i64} {
  func.func @global_pointer_kernel(%arg0: i32, %arg1: i32, %arg2: i32, %arg3: memref<1x128x32xf32, #tpu.memory_space<vmem>>, %arg4: memref<1x32x32xf32, #tpu.memory_space<vmem>>, %arg5: memref<1x32x32xf32, #tpu.memory_space<vmem>>, %arg6: memref<1x1x32xf32, #tpu.memory_space<vmem>>, %arg7: memref<1x1x32xf32, #tpu.memory_space<vmem>>, %arg8: memref<128x16xf32, #tpu.memory_space<vmem>>, %arg9: memref<128x16xf32, #tpu.memory_space<vmem>>, %arg10: memref<1x1x64x128xf32, #tpu.memory_space<vmem>>, %arg11: memref<128x16xf32, #tpu.memory_space<vmem>>) attributes {dimension_semantics = [#tpu.dimension_semantics<parallel>, #tpu.dimension_semantics<parallel>, #tpu.dimension_semantics<arbitrary>], iteration_bounds = array<i64: 2, 4, 2>, scalar_prefetch = 0 : i64, scratch_operands = 1 : i64, tpu.core_type = #tpu.core_type<tc>, window_params = [{transform_indices = @transform_0, window_bounds = array<i64: 1, 128, 32>}, {transform_indices = @transform_1, window_bounds = array<i64: 1, 32, 32>}, {transform_indices = @transform_2, window_bounds = array<i64: 1, 32, 32>}, {transform_indices = @transform_3, window_bounds = array<i64: 1, 1, 32>}, {transform_indices = @transform_4, window_bounds = array<i64: 1, 1, 32>}, {pipeline_mode = #tpu.pipeline_mode<synchronous>, transform_indices = @transform_5, window_bounds = array<i64: 128, 16>}, {pipeline_mode = #tpu.pipeline_mode<synchronous>, transform_indices = @transform_6, window_bounds = array<i64: 128, 16>}, {transform_indices = @transform_7, window_bounds = array<i64: 1, 1, 64, 128>}]} {
    %c0_i32 = arith.constant 0 : i32
    %0 = arith.cmpi eq, %arg2, %c0_i32 : i32
    %1 = arith.extui %0 : i1 to i32
    %c0_i32_0 = arith.constant 0 : i32
    %2 = arith.cmpi ne, %1, %c0_i32_0 : i32
    scf.if %2 {
      %c0_17 = arith.constant 0 : index
      %c0_18 = arith.constant 0 : index
      %29 = vector.load %arg8[%c0_17, %c0_18] : memref<128x16xf32, #tpu.memory_space<vmem>>, vector<128x16xf32>
      %c0_19 = arith.constant 0 : index
      %c0_20 = arith.constant 0 : index
      %30 = vector.load %arg9[%c0_19, %c0_20] : memref<128x16xf32, #tpu.memory_space<vmem>>, vector<128x16xf32>
      %c0_21 = arith.constant 0 : index
      %c0_22 = arith.constant 0 : index
      %c0_23 = arith.constant 0 : index
      %31 = vector.load %arg3[%c0_21, %c0_22, %c0_23] : memref<1x128x32xf32, #tpu.memory_space<vmem>>, vector<1x128x32xf32>
      %32 = vector.shape_cast %31 : vector<1x128x32xf32> to vector<128x32xf32>
      %c0_24 = arith.constant 0 : index
      %c0_25 = arith.constant 0 : index
      %c0_26 = arith.constant 0 : index
      %33 = vector.load %arg5[%c0_24, %c0_25, %c0_26] : memref<1x32x32xf32, #tpu.memory_space<vmem>>, vector<1x32x32xf32>
      %34 = vector.shape_cast %33 : vector<1x32x32xf32> to vector<32x32xf32>
      %cst_27 = arith.constant dense<0.000000e+00> : vector<128x32xf32>
      %35 = tpu.matmul %32, %34, %cst_27 {dimension_numbers = #tpu.dot_dimension_numbers<[1], [0], [0], [1], [0, 0, 1, 1], [], []>} : vector<128x32xf32>, vector<32x32xf32>, vector<128x32xf32> -> vector<128x32xf32>
      %c0_28 = arith.constant 0 : index
      %c0_29 = arith.constant 0 : index
      %c0_30 = arith.constant 0 : index
      %36 = vector.load %arg7[%c0_28, %c0_29, %c0_30] : memref<1x1x32xf32, #tpu.memory_space<vmem>>, vector<1x1x32xf32>
      %37 = vector.shape_cast %36 : vector<1x1x32xf32> to vector<1x32xf32>
      %38 = vector.broadcast %37 : vector<1x32xf32> to vector<128x32xf32>
      %39 = arith.addf %35, %38 : vector<128x32xf32>
      %40 = vector.extract_strided_slice %39 {offsets = [0, 0], sizes = [128, 16], strides = [1, 1]} : vector<128x32xf32> to vector<128x16xf32>
      %41 = arith.mulf %40, %29 : vector<128x16xf32>
      %42 = vector.extract_strided_slice %39 {offsets = [0, 16], sizes = [128, 16], strides = [1, 1]} : vector<128x32xf32> to vector<128x16xf32>
      %43 = arith.mulf %42, %30 : vector<128x16xf32>
      %44 = arith.addf %41, %43 : vector<128x16xf32>
      %c0_31 = arith.constant 0 : index
      %c0_32 = arith.constant 0 : index
      %45 = vector.load %arg11[%c0_31, %c0_32] : memref<128x16xf32, #tpu.memory_space<vmem>>, vector<128x16xf32>
      tpu.vector_store %arg11[%c0_31, %c0_32], %44 {strides = array<i32>} : memref<128x16xf32, #tpu.memory_space<vmem>>, vector<128x16xf32>,
    } else {
    }
    %c64_i32 = arith.constant 64 : i32
    %3 = arith.muli %arg2, %c64_i32 : i32
    %4 = tpu.assume_multiple %3, 64 : i32
    %c0 = arith.constant 0 : index
    %5 = arith.index_cast %4 : i32 to index
    %c0_1 = arith.constant 0 : index
    %6 = vector.load %arg3[%c0, %5, %c0_1] : memref<1x128x32xf32, #tpu.memory_space<vmem>>, vector<1x64x32xf32>
    %7 = vector.shape_cast %6 : vector<1x64x32xf32> to vector<64x32xf32>
    %c0_2 = arith.constant 0 : index
    %c0_3 = arith.constant 0 : index
    %c0_4 = arith.constant 0 : index
    %8 = vector.load %arg4[%c0_2, %c0_3, %c0_4] : memref<1x32x32xf32, #tpu.memory_space<vmem>>, vector<1x32x32xf32>
    %9 = vector.shape_cast %8 : vector<1x32x32xf32> to vector<32x32xf32>
    %cst = arith.constant dense<0.000000e+00> : vector<64x32xf32>
    %10 = tpu.matmul %7, %9, %cst {dimension_numbers = #tpu.dot_dimension_numbers<[1], [0], [0], [1], [0, 0, 1, 1], [], []>} : vector<64x32xf32>, vector<32x32xf32>, vector<64x32xf32> -> vector<64x32xf32>
    %c0_5 = arith.constant 0 : index
    %c0_6 = arith.constant 0 : index
    %c0_7 = arith.constant 0 : index
    %11 = vector.load %arg6[%c0_5, %c0_6, %c0_7] : memref<1x1x32xf32, #tpu.memory_space<vmem>>, vector<1x1x32xf32>
    %12 = vector.shape_cast %11 : vector<1x1x32xf32> to vector<1x32xf32>
    %13 = vector.broadcast %12 : vector<1x32xf32> to vector<64x32xf32>
    %14 = arith.addf %10, %13 : vector<64x32xf32>
    %15 = arith.index_cast %4 : i32 to index
    %c0_8 = arith.constant 0 : index
    %16 = vector.load %arg8[%15, %c0_8] : memref<128x16xf32, #tpu.memory_space<vmem>>, vector<64x16xf32>
    %17 = arith.index_cast %4 : i32 to index
    %c0_9 = arith.constant 0 : index
    %18 = vector.load %arg9[%17, %c0_9] : memref<128x16xf32, #tpu.memory_space<vmem>>, vector<64x16xf32>
    %19 = vector.extract_strided_slice %14 {offsets = [0, 0], sizes = [64, 16], strides = [1, 1]} : vector<64x32xf32> to vector<64x16xf32>
    %20 = arith.mulf %19, %16 : vector<64x16xf32>
    %21 = vector.extract_strided_slice %14 {offsets = [0, 16], sizes = [64, 16], strides = [1, 1]} : vector<64x32xf32> to vector<64x16xf32>
    %22 = arith.mulf %21, %18 : vector<64x16xf32>
    %23 = arith.addf %20, %22 : vector<64x16xf32>
    %c0_10 = arith.constant 0 : index
    %c0_11 = arith.constant 0 : index
    %24 = vector.load %arg11[%c0_10, %c0_11] : memref<128x16xf32, #tpu.memory_space<vmem>>, vector<128x16xf32>
    %cst_12 = arith.constant dense<0.000000e+00> : vector<64x128xf32>
    %25 = tpu.matmul %23, %24, %cst_12 {dimension_numbers = #tpu.dot_dimension_numbers<[1], [1], [0], [0], [0, 0, 1, 0], [], []>} : vector<64x16xf32>, vector<128x16xf32>, vector<64x128xf32> -> vector<64x128xf32>
    %c0_13 = arith.constant 0 : index
    %c0_14 = arith.constant 0 : index
    %c0_15 = arith.constant 0 : index
    %c0_16 = arith.constant 0 : index
    %26 = vector.load %arg10[%c0_13, %c0_14, %c0_15, %c0_16] : memref<1x1x64x128xf32, #tpu.memory_space<vmem>>, vector<1x1x64x128xf32>
    %27 = vector.shape_cast %26 : vector<1x1x64x128xf32> to vector<64x128xf32>
    %28 = vector.shape_cast %25 : vector<64x128xf32> to vector<1x1x64x128xf32>
    tpu.vector_store %arg10[%c0_13, %c0_14, %c0_15, %c0_16], %28 {strides = array<i32>} : memref<1x1x64x128xf32, #tpu.memory_space<vmem>>, vector<1x1x64x128xf32>,
    return
  }
  func.func @transform_0(%arg0: i32, %arg1: i32, %arg2: i32) -> (i32, i32, i32) {
    %c0_i32 = arith.constant 0 : i32
    %c0_i32_0 = arith.constant 0 : i32
    %c0_i32_1 = arith.constant 0 : i32
    return %arg0, %c0_i32, %c0_i32_0 : i32, i32, i32
  }
  func.func @transform_1(%arg0: i32, %arg1: i32, %arg2: i32) -> (i32, i32, i32) {
    %c0_i32 = arith.constant 0 : i32
    %c0_i32_0 = arith.constant 0 : i32
    %c0_i32_1 = arith.constant 0 : i32
    return %arg1, %c0_i32, %c0_i32_0 : i32, i32, i32
  }
  func.func @transform_2(%arg0: i32, %arg1: i32, %arg2: i32) -> (i32, i32, i32) {
    %c0_i32 = arith.constant 0 : i32
    %c0_i32_0 = arith.constant 0 : i32
    %c0_i32_1 = arith.constant 0 : i32
    return %arg1, %c0_i32, %c0_i32_0 : i32, i32, i32
  }
  func.func @transform_3(%arg0: i32, %arg1: i32, %arg2: i32) -> (i32, i32, i32) {
    %c0_i32 = arith.constant 0 : i32
    %c0_i32_0 = arith.constant 0 : i32
    %c0_i32_1 = arith.constant 0 : i32
    return %arg1, %c0_i32, %c0_i32_0 : i32, i32, i32
  }
  func.func @transform_4(%arg0: i32, %arg1: i32, %arg2: i32) -> (i32, i32, i32) {
    %c0_i32 = arith.constant 0 : i32
    %c0_i32_0 = arith.constant 0 : i32
    %c0_i32_1 = arith.constant 0 : i32
    return %arg1, %c0_i32, %c0_i32_0 : i32, i32, i32
  }
  func.func @transform_5(%arg0: i32, %arg1: i32, %arg2: i32) -> (i32, i32) {
    %c0_i32 = arith.constant 0 : i32
    %c0_i32_0 = arith.constant 0 : i32
    %c0_i32_1 = arith.constant 0 : i32
    return %c0_i32, %c0_i32_0 : i32, i32
  }
  func.func @transform_6(%arg0: i32, %arg1: i32, %arg2: i32) -> (i32, i32) {
    %c0_i32 = arith.constant 0 : i32
    %c0_i32_0 = arith.constant 0 : i32
    %c0_i32_1 = arith.constant 0 : i32
    return %c0_i32, %c0_i32_0 : i32, i32
  }
  func.func @transform_7(%arg0: i32, %arg1: i32, %arg2: i32) -> (i32, i32, i32, i32) {
    %c0_i32 = arith.constant 0 : i32
    %c0_i32_0 = arith.constant 0 : i32
    return %arg0, %arg1, %arg2, %c0_i32 : i32, i32, i32, i32
  }
}

</mosaic_0001>

<bundles_post_ra>
// kernel: tpu_custom_call.1
= control target key start
LH: loop header
LB: loop body
LE: loop exit
PB: predicated region body
PF: predicated region fallthrough
CT: control target
= control target key end

     0   :  { %12 = vsyncpa [#allocation4], 0  ;;  %s2213_s0 = inlined_call_operand.vmem [shape: f32[2,128,32], index: 0, kind: input, shape index: {}]   ;;  %s2214_s1 = inlined_call_operand.vmem [shape: f32[4,32,32], index: 1, kind: input, shape index: {}]   ;;  %s2215_s2 = inlined_call_operand.vmem [shape: f32[4,32,32], index: 2, kind: input, shape index: {}]   ;;  %s2216_s3 = inlined_call_operand.vmem [shape: f32[4,1,32], index: 3, kind: input, shape index: {}]   ;;  %s2217_s4 = inlined_call_operand.vmem [shape: f32[4,1,32], index: 4, kind: input, shape index: {}]   ;;  %s2218_s5 = inlined_call_operand.vmem [shape: f32[128,16], index: 5, kind: input, shape index: {}]   ;;  %s2219_s6 = inlined_call_operand.vmem [shape: f32[128,16], index: 6, kind: input, shape index: {}]   ;;  %s2220_s7 = inlined_call_operand.hbm [shape: f32[2,4,128,128], index: 7, kind: output, shape index: {}]  }
   0x1   :  { %14 = vsyncpa [#allocation4 + $0x1], 0  ;;  %s1601_s24 = smov 0   ;;  %s1603_s25 = smov 0  }
   0x2   :  { %s1605_s26 = smov 0   ;;  %s1607_s27 = smov 0  }
   0x3   :  { %s1609_s28 = smov 0   ;;  %s1611_s29 = smov 0  }
   0x4   :  { %s1613_s30 = smov 0   ;;  %s1615_s8 = smov 0  }
   0x5   :  { %s1617_s9 = smov 0   ;;  %s1619_s10 = smov 0  }
   0x6 LB: > { %2233 = sst [smem:[#allocation6_spill]] %s1517_s24  ;;  %s1216_s11 = sadd.s32 4294967295, %s1553_s10   ;;  %s1553_s10 = sphi %s1619_s10, %s20_s10   ;;  %s1549_s9 = sphi %s1617_s9, %s2257_s9   ;;  %s1545_s8 = sphi %s1615_s8, %s2256_s8   ;;  %s1541_s30 = sphi %s1613_s30, %s2255_s30   ;;  %s1537_s29 = sphi %s1611_s29, %s2254_s29   ;;  %s1533_s28 = sphi %s1609_s28, %s2253_s28   ;;  %s1529_s27 = sphi %s1607_s27, %s2252_s27   ;;  %s1525_s26 = sphi %s1605_s26, %s2251_s26   ;;  %s1521_s25 = sphi %s1603_s25, %s2259_s25   ;;  %s1517_s24 = sphi %s1601_s24, %s2258_s24  }
   0x7   : > { %2234 = sst [smem:[#allocation7_spill]] %s1525_s26  ;;  %s32_s12 = sadd.s32 1, %s1541_s30 }
   0x8   : > { %2235 = sst [smem:[#allocation8_spill]] %s1541_s30  ;;  %p33_p0 = scmp.ge.s32.totalorder %s32_s12, 2 }
   0x9   : > { %2236 = sst [smem:[#allocation9_spill]] %s1545_s8  ;;  %s35_s13 = sadd.s32 1, %s1545_s8 }
   0xa   : > { %2237 = sst [smem:[#allocation10_spill]] %s1549_s9  ;;  %s1217_s14 = sadd.s32 4294967294, %s1553_s10  }
   0xb   : > { %2238 = sst [smem:[#allocation11_spill]] %s1553_s10  ;;  %p232_p1 = scmp.ne.s32.totalorder %s1525_s26, %s1521_s25 }
   0xc   : > { %s2261_s12 = smov (%p33_p0, %s32_s12), 0  ;;  %s2263_s13 = smov (!%p33_p0, %s35_s13), %s1545_s8 }
   0xd   : > { %2239 = sst [smem:[#allocation12_spill]] %s2261_s12  ;;  %s39_s15 = sadd.s32 1, %s1549_s9 }
   0xe   : > { %p233_p2 = scmp.eq.s32.totalorder %s1216_s11, 15  ;;  %p37_p3 = scmp.ge.s32.totalorder %s2263_s13, 4 }
   0xf   : > { %p238_p4 = scmp.ne.s32.totalorder %s1521_s25, %s1517_s24  ;;  %p239_p6 = scmp.eq.s32.totalorder %s1217_s14, 15 }
  0x10   : > { %p1663_p5 = por %p233_p2, %p232_p1  ;;  %s2265_s13 = smov (%p37_p3, %s2263_s13), 0 }
  0x11   : > { %2241 = sst [smem:[#allocation13_spill]] %s2265_s13  ;;  %s2267_s15 = smov (!%p37_p3, %s39_s15), %s1549_s9 }
  0x12   : > { %p1670_p7 = por %p239_p6, %p238_p4  ;;  %p41_p8 = scmp.ge.s32.totalorder %s2267_s15, 2 }
  0x13   : > { %p1220_p9 = scmp.ge.s32.totalorder %s1553_s10, 1  ;;  %s216_s18 = ssub.s32 %s1545_s8, %s2265_s13 }
  0x14   : > { %s2242_s17 = scalar_select %p1670_p7, 1, 0 }
  0x15   : > { %p299_p10 = scmp.lt.s32.totalorder %s1553_s10, 17  ;;  %s2269_s15 = smov (%p41_p8, %s2267_s15), 0 }
  0x16   : > { %2243 = sst [smem:[#allocation14_spill]] %s2242_s17  ;;  %s218_s19 = ssub.s32 %s1541_s30, %s2261_s12 }
  0x17   : > { %2244 = sst [smem:[#allocation15_spill]] %s2269_s15  ;;  %p300_p11 = pnand %p1220_p9, %p299_p10 }
  0x18   : > { %s215_s20 = ssub.s32 %s1549_s9, %s2269_s15  ;;  %s222_s23 = sadd.s32 1, %s1525_s26 }
  0x19   : > { %s217_s21 = sor.u32 %s216_s18, %s215_s20  ;;  %s2226_s14 = sand.u32 (!%p300_p11), 1, %s1521_s25  }
  0x1a   : > { %s219_s22 = sor.u32 %s218_s19, %s217_s21  ;;  %p347_p13 = scmp.lt.s32.totalorder (!%p300_p11), %s1537_s29, 1 }
  0x1b   : > { %p220_p12 = scmp.eq.s32.totalorder %s219_s22, 0  ;;  %303 = sbr.rel (%p300_p11) target bundleno = 787 (0x313), region = 48 }
  0x1c   : > { %s1221_s13 = sshll.u32 (!%p300_p11), %s2226_s14, 6  ;;  %p352_p0 = scmp.lt.s32.totalorder (!%p300_p11), %s1533_s28, 3 }
  0x1d   : > { %s1686_s11 = scalar_select %p220_p12, %s1525_s26, %s222_s23  }
  0x1e   : > { %p1228_p1 = scmp.ne.s32.totalorder (!%p300_p11), %s1529_s27, 0 }
  0x1f   : > { %2245 = sst [smem:[#allocation16_spill]] %s1686_s11 }
  0x20   : > { %s348_s12 = scalar_select %p347_p13, %s1537_s29, 1 }
  0x21   : > { %s1695_s15 = scalar_select %p352_p0, %s1533_s28, 3 }
  0x22   : > { %s1285_s18 = sshll.u32 %s348_s12, 7  ;;  %372 = sbr.rel (%p1228_p1) target bundleno = 340 (0x154), region = 52 }
  0x23   : > { %s1700_s21 = scalar_lea.vmem %s2213_s0, %s1285_s18  ;;  %s1286_s22 = sshll.u32 %s1695_s15, 5 }
  0x24   : > { %s1706_s8 = scalar_lea.vmem %s2214_s1, %s1286_s22  ;;  %s361_s11 = scalar_lea.vmem %s2215_s2, %s1286_s22 }
  0x25   : > { %s364_s24 = scalar_lea.vmem %s2216_s3, %s1695_s15  ;;  %s367_s19 = scalar_lea.vmem %s2217_s4, %s1695_s15 }
  0x26   : > { %s1719_s18 = scalar_lea.vmem [#allocation3], %s1221_s13  ;;  %s1555_s26 = smov (!%p1228_p1), 16  }
  0x27   : > { %v424_v0 = vld [vmem:[%s361_s11 + $0x18] sm:$0xff]  ;;  %v389_v1 = vld [vmem:[%s2219_s6] sm:$0xff]  ;;  %v423_v2 = vld [vmem:[%s361_s11 + $0x10] sm:$0xff]  ;;  %vm429_vm0 = vcmask 261120   ;;  %vm719_vm1 = vcmask 130048  }
  0x28   : > { %490 = vmatpush.msra.mxu0 %v424_v0  ;;  %1288 = vmatpush.msra.mxu1 %v424_v0  ;;  %v422_v3 = vld [vmem:[%s361_s11 + $0x8] sm:$0xff]  ;;  %v421_v4 = vld [vmem:[%s361_s11] sm:$0xff]  ;;  %v391_v9 = vld [vmem:[%s2219_s6 + $0x10] sm:$0xff] }
  0x29   : > { %1289 = vmatpush.msra.mxu2 %v424_v0  ;;  %575 = vrot.lane.b32.xlu0 %v389_v1, %s1555_s26  ;;  %v405_v5 = vld [vmem:[%s1700_s21] sm:$0xff]  ;;  %v390_v8 = vld [vmem:[%s2219_s6 + $0x8] sm:$0xff]  ;;  %v395_v15 = vld [vmem:[%s2219_s6 + $0x30] sm:$0xff] }
  0x2a   : > { %491 = vmatpush.msra.mxu0 %v423_v2  ;;  %1291 = vmatpush.msra.mxu1 %v423_v2  ;;  %v409_v6 = vld [vmem:[%s1700_s21 + $0x20] sm:$0xff]  ;;  %v406_v12 = vld [vmem:[%s1700_s21 + $0x8] sm:$0xff]  ;;  %v392_v16 = vld [vmem:[%s2219_s6 + $0x18] sm:$0xff] }
  0x2b   : > { %1292 = vmatpush.msra.mxu2 %v423_v2  ;;  %1290 = vmatpush.msra.mxu3 %v424_v0  ;;  %v413_v7 = vld [vmem:[%s1700_s21 + $0x40] sm:$0xff]  ;;  %v410_v13 = vld [vmem:[%s1700_s21 + $0x28] sm:$0xff]  ;;  %v407_v19 = vld [vmem:[%s1700_s21 + $0x10] sm:$0xff] }
  0x2c   : > { %492 = vmatpush.msra.mxu0 %v422_v3  ;;  %1294 = vmatpush.msra.mxu1 %v422_v3  ;;  %v393_v10 = vld [vmem:[%s2219_s6 + $0x20] sm:$0xff]  ;;  %v414_v14 = vld [vmem:[%s1700_s21 + $0x48] sm:$0xff]  ;;  %v411_v20 = vld [vmem:[%s1700_s21 + $0x30] sm:$0xff] }
  0x2d   : > { %1295 = vmatpush.msra.mxu2 %v422_v3  ;;  %1293 = vmatpush.msra.mxu3 %v423_v2  ;;  %v417_v11 = vld [vmem:[%s1700_s21 + $0x60] sm:$0xff]  ;;  %v394_v17 = vld [vmem:[%s2219_s6 + $0x28] sm:$0xff]  ;;  %v415_v21 = vld [vmem:[%s1700_s21 + $0x50] sm:$0xff] }
  0x2e   : > { %493 = vmatpush.msra.mxu0 %v421_v4  ;;  %1297 = vmatpush.msra.mxu1 %v421_v4  ;;  %v418_v18 = vld [vmem:[%s1700_s21 + $0x68] sm:$0xff]  ;;  %v396_v23 = vld [vmem:[%s2219_s6 + $0x38] sm:$0xff]  ;;  %v397_v24 = vld [vmem:[%s2219_s6 + $0x40] sm:$0xff] }
  0x2f   : > { %1298 = vmatpush.msra.mxu2 %v421_v4  ;;  %1229 = vmatmul.msk.f32.vlgmr.msra.gmra.mxu0 %vm429_vm0, %v405_v5  ;;  %v398_v22 = vld [vmem:[%s2219_s6 + $0x48] sm:$0xff]  ;;  %v419_v25 = vld [vmem:[%s1700_s21 + $0x70] sm:$0xff]  ;;  %v408_v26 = vld [vmem:[%s1700_s21 + $0x18] sm:$0xff] }
  0x30   : > { %1233 = vmatmul.msk.f32.vlgmr.msra.gmra.mxu1 %vm429_vm0, %v409_v6  ;;  %1237 = vmatmul.msk.f32.vlgmr.msra.gmra.mxu2 %vm429_vm0, %v413_v7  ;;  %v416_v27 = vld [vmem:[%s1700_s21 + $0x58] sm:$0xff]  ;;  %v401_v29 = vld [vmem:[%s2219_s6 + $0x60] sm:$0xff]  ;;  %v399_v30 = vld [vmem:[%s2219_s6 + $0x50] sm:$0xff] }
  0x31   : > { %577 = vrot.lane.b32.xlu0 %v390_v8, %s1555_s26  ;;  %1296 = vmatpush.msra.mxu3 %v422_v3  ;;  %v412_v28 = vld [vmem:[%s1700_s21 + $0x38] sm:$0xff]  ;;  %v402_v34 = vld [vmem:[%s2219_s6 + $0x68] sm:$0xff]  ;;  %v403_v35 = vld [vmem:[%s2219_s6 + $0x70] sm:$0xff] }
  0x32   : > { %579 = vrot.lane.b32.xlu1 %v391_v9, %s1555_s26  ;;  %583 = vrot.lane.b32.xlu2 %v393_v10, %s1555_s26  ;;  %v400_v31 = vld [vmem:[%s2219_s6 + $0x58] sm:$0xff]  ;;  %v1823_v41 = vld [vmem:[%s367_s19] ss:$0 sm:$0xff] }
  0x33   : > { %1299 = vmatpush.msra.mxu3 %v421_v4  ;;  %v420_v32 = vld [vmem:[%s1700_s21 + $0x78] sm:$0xff] }
  0x34   : > { %1241 = vmatmul.msk.f32.vlgmr.msra.gmra.mxu3 %vm429_vm0, %v417_v11  ;;  %v404_v33 = vld [vmem:[%s2219_s6 + $0x78] sm:$0xff] }
  0x37   : > { %1230 = vmatmul.msk.f32.gmra.mxu0 %vm429_vm0, %v406_v12 }
  0x38   : > { %1234 = vmatmul.msk.f32.gmra.mxu1 %vm429_vm0, %v410_v13  ;;  %1238 = vmatmul.msk.f32.gmra.mxu2 %vm429_vm0, %v414_v14 }
  0x39   : > { %587 = vrot.lane.b32.xlu0 %v395_v15, %s1555_s26 }
  0x3a   : > { %581 = vrot.lane.b32.xlu1 %v392_v16, %s1555_s26  ;;  %585 = vrot.lane.b32.xlu2 %v394_v17, %s1555_s26 }
  0x3c   : > { %1242 = vmatmul.msk.f32.gmra.mxu3 %vm429_vm0, %v418_v18 }
  0x3f   : > { %1231 = vmatmul.msk.f32.gmra.mxu0 %vm429_vm0, %v407_v19 }
  0x40   : > { %1235 = vmatmul.msk.f32.gmra.mxu1 %vm429_vm0, %v411_v20  ;;  %1239 = vmatmul.msk.f32.gmra.mxu2 %vm429_vm0, %v415_v21 }
  0x41   : > { %593 = vrot.lane.b32.xlu0 %v398_v22, %s1555_s26 }
  0x42   : > { %589 = vrot.lane.b32.xlu1 %v396_v23, %s1555_s26  ;;  %591 = vrot.lane.b32.xlu2 %v397_v24, %s1555_s26 }
  0x44   : > { %1243 = vmatmul.msk.f32.gmra.mxu3 %vm429_vm0, %v419_v25 }
  0x47   : > { %1232 = vmatmul.msk.f32.gmra.mxu0 %vm429_vm0, %v408_v26 }
  0x48   : > { %1240 = vmatmul.msk.f32.gmra.mxu2 %vm429_vm0, %v416_v27  ;;  %1236 = vmatmul.msk.f32.gmra.mxu1 %vm429_vm0, %v412_v28 }
  0x49   : > { %599 = vrot.lane.b32.xlu0 %v401_v29, %s1555_s26 }
  0x4a   : > { %595 = vrot.lane.b32.xlu1 %v399_v30, %s1555_s26  ;;  %597 = vrot.lane.b32.xlu2 %v400_v31, %s1555_s26 }
  0x4c   : > { %1244 = vmatmul.msk.f32.gmra.mxu3 %vm429_vm0, %v420_v32 }
  0x51   : > { %605 = vrot.lane.b32.xlu0 %v404_v33, %s1555_s26 }
  0x52   : > { %601 = vrot.lane.b32.xlu1 %v402_v34, %s1555_s26  ;;  %603 = vrot.lane.b32.xlu2 %v403_v35, %s1555_s26  ;;  %s1556_s26 = smov 112  }
  0x8c   : > { %v584_v37 = vpop.permute.xlu2 %583 }
  0x94   : > { %v586_v40 = vpop.permute.xlu2 %585 }
  0x9b   : > { %v576_v36 = vpop.permute.xlu0 %575 }
  0x9c   : > { %v592_v50 = vpop.permute.xlu2 %591 }
  0xa3   : > { %v578_v38 = vpop.permute.xlu0 %577 }
  0xa4   : > { %v580_v39 = vpop.permute.xlu1 %579  ;;  %v598_v17 = vpop.permute.xlu2 %597 }
  0xab   : > { %v588_v42 = vpop.permute.xlu0 %587 }
  0xac   : > { %v495_v43 = vpop.f32.mrf.mxu0  ;;  %v582_v49 = vpop.permute.xlu1 %581 }
  0xad   : > { %v1826_v44 = vadd.f32 %v1823_v41, %v495_v43  ;;  %v507_v45 = vpop.f32.mrf.mxu1  ;;  %v604_v29 = vpop.permute.xlu2 %603 }
  0xae   : > { %v1829_v46 = vadd.f32 %v1823_v41, %v507_v45 }
  0xaf   : > { %v623_v47 = vmul.f32 %v576_v36, %v1826_v44 }
  0xb0   : > { %v627_v48 = vmul.f32 %v584_v37, %v1829_v46  ;;  %v377_v37 = vld [vmem:[%s2218_s5 + $0x20] sm:$0xff] }
  0xb1   : > { %655 = vrot.lane.b32.xlu1 %v623_v47, %s1556_s26  ;;  %v383_v47 = vld [vmem:[%s2218_s5 + $0x50] sm:$0xff] }
  0xb2   : > { %663 = vrot.lane.b32.xlu2 %v627_v48, %s1556_s26 }
  0xb3   : > { %v519_v51 = vpop.f32.mrf.mxu2  ;;  %v594_v52 = vpop.permute.xlu0 %593 }
  0xb4   : > { %v1836_v53 = vadd.f32 %v1823_v41, %v519_v51  ;;  %v498_v54 = vpop.f32.mrf.mxu0  ;;  %v590_v62 = vpop.permute.xlu1 %589 }
  0xb5   : > { %v1839_v55 = vadd.f32 %v1823_v41, %v498_v54  ;;  %v510_v56 = vpop.f32.mrf.mxu1 }
  0xb6   : > { %v631_v57 = vmul.f32 %v592_v50, %v1836_v53  ;;  %v1848_v61 = vadd.f32 %v1823_v41, %v510_v56  ;;  %v381_v56 = vld [vmem:[%s2218_s5 + $0x40] sm:$0xff] }
  0xb7   : > { %v624_v58 = vmul.f32 %v578_v38, %v1839_v55  ;;  %v531_v59 = vpop.f32.mrf.mxu3  ;;  %v547_v38 = vmul.f32 %v1829_v46, %v377_v37  ;;  %v373_v46 = vld [vmem:[%s2218_s5] sm:$0xff] }
  0xb8   : > { %671 = vrot.lane.b32.xlu0 %v631_v57, %s1556_s26  ;;  %v1845_v60 = vadd.f32 %v1823_v41, %v531_v59  ;;  %v628_v4 = vmul.f32 %v586_v40, %v1848_v61  ;;  %v543_v50 = vmul.f32 %v1826_v44, %v373_v46 }
  0xba   : > { %657 = vrot.lane.b32.xlu2 %v624_v58, %s1556_s26  ;;  %v551_v58 = vmul.f32 %v1836_v53, %v381_v56  ;;  %v378_v53 = vld [vmem:[%s2218_s5 + $0x28] sm:$0xff] }
  0xbb   : > { %v522_v63 = vpop.f32.mrf.mxu2  ;;  %v600_v0 = vpop.permute.xlu0 %599 }
  0xbc   : > { %v635_v1 = vmul.f32 %v600_v0, %v1845_v60  ;;  %v501_v3 = vpop.f32.mrf.mxu0  ;;  %v1855_v6 = vadd.f32 %v1823_v41, %v522_v63  ;;  %v596_v12 = vpop.permute.xlu1 %595  ;;  %v385_v0 = vld [vmem:[%s2218_s5 + $0x60] sm:$0xff] }
  0xbd   : > { %v513_v2 = vpop.f32.mrf.mxu1  ;;  %v1859_v7 = vadd.f32 %v1823_v41, %v501_v3 }
  0xbe   : > { %679 = vrot.lane.b32.xlu1 %v635_v1, %s1556_s26  ;;  %v632_v9 = vmul.f32 %v594_v52, %v1855_v6  ;;  %v1866_v15 = vadd.f32 %v1823_v41, %v513_v2  ;;  %v386_v1 = vld [vmem:[%s2218_s5 + $0x68] sm:$0xff]  ;;  %v555_v2 = vmul.f32 %v1845_v60, %v385_v0  ;;  %v375_v60 = vld [vmem:[%s2218_s5 + $0x10] sm:$0xff] }
  0xbf   : > { %v534_v5 = vpop.f32.mrf.mxu3  ;;  %v625_v10 = vmul.f32 %v580_v39, %v1859_v7 }
  0xc0   : > { %665 = vrot.lane.b32.xlu0 %v628_v4, %s1556_s26  ;;  %v629_v21 = vmul.f32 %v588_v42, %v1866_v15  ;;  %v535_v26 = vadd.f32 %v1823_v41, %v534_v5 }
  0xc2   : > { %v556_v5 = vmul.f32 %v535_v26, %v386_v1 }
  0xc3   : > { %v525_v8 = vpop.f32.mrf.mxu2  ;;  %v606_v35 = vpop.permute.xlu0 %605 }
  0xc4   : > { %v526_v11 = vadd.f32 %v1823_v41, %v525_v8  ;;  %v504_v20 = vpop.f32.mrf.mxu0  ;;  %v602_v30 = vpop.permute.xlu1 %601  ;;  %v548_v8 = vmul.f32 %v1848_v61, %v378_v53 }
  0xc5   : > { %v516_v13 = vpop.f32.mrf.mxu1  ;;  %v1878_v25 = vadd.f32 %v1823_v41, %v504_v20  ;;  %v636_v32 = vmul.f32 %v602_v30, %v535_v26  ;;  %v379_v20 = vld [vmem:[%s2218_s5 + $0x30] sm:$0xff] }
  0xc6   : > { %v633_v14 = vmul.f32 %v596_v12, %v526_v11  ;;  %673 = vrot.lane.b32.xlu1 %v632_v9, %s1556_s26  ;;  %v517_v16 = vadd.f32 %v1823_v41, %v516_v13  ;;  %v553_v48 = vmul.f32 %v526_v11, %v383_v47  ;;  %v382_v13 = vld [vmem:[%s2218_s5 + $0x48] sm:$0xff]  ;;  %v387_v30 = vld [vmem:[%s2218_s5 + $0x70] sm:$0xff] }
  0xc7   : > { %v537_v18 = vpop.f32.mrf.mxu3  ;;  %v626_v27 = vmul.f32 %v582_v49, %v1878_v25  ;;  %v552_v61 = vmul.f32 %v1855_v6, %v382_v13  ;;  %v549_v6 = vmul.f32 %v1866_v15, %v379_v20 }
  0xc8   : > { %659 = vrot.lane.b32.xlu0 %v625_v10, %s1556_s26  ;;  %675 = vrot.lane.b32.xlu2 %v633_v14, %s1556_s26  ;;  %v630_v22 = vmul.f32 %v590_v62, %v517_v16  ;;  %v1885_v28 = vadd.f32 %v1823_v41, %v537_v18 }
  0xca   : > { %v637_v33 = vmul.f32 %v604_v29, %v1885_v28  ;;  %v376_v29 = vld [vmem:[%s2218_s5 + $0x18] sm:$0xff] }
  0xcb   : > { %v528_v19 = vpop.f32.mrf.mxu2  ;;  %v546_v15 = vmul.f32 %v1878_v25, %v376_v29 }
  0xcc   : > { %v1873_v23 = vadd.f32 %v1823_v41, %v528_v19 }
  0xce   : > { %v634_v24 = vmul.f32 %v598_v17, %v1873_v23  ;;  %667 = vrot.lane.b32.xlu1 %v629_v21, %s1556_s26  ;;  %v545_v17 = vmul.f32 %v1859_v7, %v375_v60  ;;  %v384_v21 = vld [vmem:[%s2218_s5 + $0x58] sm:$0xff] }
  0xcf   : > { %v540_v31 = vpop.f32.mrf.mxu3  ;;  %v554_v7 = vmul.f32 %v1873_v23, %v384_v21  ;;  %v557_v23 = vmul.f32 %v1885_v28, %v387_v30 }
  0xd0   : > { %677 = vrot.lane.b32.xlu0 %v634_v24, %s1556_s26  ;;  %669 = vrot.lane.b32.xlu2 %v630_v22, %s1556_s26  ;;  %v1890_v34 = vadd.f32 %v1823_v41, %v540_v31  ;;  %v374_v41 = vld [vmem:[%s2218_s5 + $0x8] sm:$0xff] }
  0xd1   : > { %v544_v42 = vmul.f32 %v1839_v55, %v374_v41  ;;  %v380_v55 = vld [vmem:[%s2218_s5 + $0x38] sm:$0xff] }
  0xd2   : > { %v638_v36 = vmul.f32 %v606_v35, %v1890_v34  ;;  %v550_v57 = vmul.f32 %v517_v16, %v380_v55 }
  0xd6   : > { %661 = vrot.lane.b32.xlu1 %v626_v27, %s1556_s26 }
  0xd8   : > { %683 = vrot.lane.b32.xlu0 %v637_v33, %s1556_s26  ;;  %681 = vrot.lane.b32.xlu2 %v636_v32, %s1556_s26 }
  0xde   : > { %685 = vrot.lane.b32.xlu1 %v638_v36, %s1556_s26  ;;  %v388_v36 = vld [vmem:[%s2218_s5 + $0x78] sm:$0xff] }
  0xdf   : > { %v558_v37 = vmul.f32 %v1890_v34, %v388_v36 }
 0x10c   : > { %v664_v39 = vpop.permute.xlu2 %663 }
 0x10d   : > { %v707_v40 = vadd.f32 %v664_v39, %v547_v38 }
 0x10f   : > { %724 = vst.msk [vmem:[#allocation2 + $0x20] sm:$0xff] %vm719_vm1, %v707_v40 }
 0x114   : > { %v658_v43 = vpop.permute.xlu2 %657 }
 0x115   : > { %v704_v45 = vadd.f32 %v658_v43, %v544_v42 }
 0x117   : > { %721 = vst.msk [vmem:[#allocation2 + $0x8] sm:$0xff] %vm719_vm1, %v704_v45 }
 0x122   : > { %v676_v49 = vpop.permute.xlu2 %675 }
 0x123   : > { %v713_v51 = vadd.f32 %v676_v49, %v553_v48  ;;  %v656_v52 = vpop.permute.xlu1 %655 }
 0x124   : > { %v703_v54 = vadd.f32 %v656_v52, %v543_v50 }
 0x125   : > { %730 = vst.msk [vmem:[#allocation2 + $0x50] sm:$0xff] %vm719_vm1, %v713_v51 }
 0x126   : > { %720 = vst.msk [vmem:[#allocation2] sm:$0xff] %vm719_vm1, %v703_v54 }
 0x12a   : > { %v670_v59 = vpop.permute.xlu2 %669  ;;  %v672_v44 = vpop.permute.xlu0 %671 }
 0x12b   : > { %v710_v62 = vadd.f32 %v670_v59, %v550_v57  ;;  %v711_v63 = vadd.f32 %v672_v44, %v551_v58 }
 0x12d   : > { %727 = vst.msk [vmem:[#allocation2 + $0x38] sm:$0xff] %vm719_vm1, %v710_v62 }
 0x12e   : > { %728 = vst.msk [vmem:[#allocation2 + $0x40] sm:$0xff] %vm719_vm1, %v711_v63 }
 0x130   : > { %v680_v3 = vpop.permute.xlu1 %679 }
 0x131   : > { %v715_v4 = vadd.f32 %v680_v3, %v555_v2 }
 0x132   : > { %v682_v9 = vpop.permute.xlu2 %681  ;;  %v666_v10 = vpop.permute.xlu0 %665 }
 0x133   : > { %732 = vst.msk [vmem:[#allocation2 + $0x60] sm:$0xff] %vm719_vm1, %v715_v4  ;;  %v716_v11 = vadd.f32 %v682_v9, %v556_v5  ;;  %v708_v12 = vadd.f32 %v666_v10, %v548_v8 }
 0x135   : > { %733 = vst.msk [vmem:[#allocation2 + $0x68] sm:$0xff] %vm719_vm1, %v716_v11 }
 0x136   : > { %725 = vst.msk [vmem:[#allocation2 + $0x28] sm:$0xff] %vm719_vm1, %v708_v12 }
 0x138   : > { %v674_v14 = vpop.permute.xlu1 %673 }
 0x139   : > { %v712_v16 = vadd.f32 %v674_v14, %v552_v61 }
 0x13a   : > { %v660_v18 = vpop.permute.xlu0 %659 }
 0x13b   : > { %729 = vst.msk [vmem:[#allocation2 + $0x48] sm:$0xff] %vm719_vm1, %v712_v16  ;;  %v705_v19 = vadd.f32 %v660_v18, %v545_v17 }
 0x13d   : > { %722 = vst.msk [vmem:[#allocation2 + $0x10] sm:$0xff] %vm719_vm1, %v705_v19 }
 0x140   : > { %v668_v22 = vpop.permute.xlu1 %667 }
 0x141   : > { %v709_v24 = vadd.f32 %v668_v22, %v549_v6 }
 0x142   : > { %v678_v26 = vpop.permute.xlu0 %677 }
 0x143   : > { %726 = vst.msk [vmem:[#allocation2 + $0x30] sm:$0xff] %vm719_vm1, %v709_v24  ;;  %v714_v27 = vadd.f32 %v678_v26, %v554_v7 }
 0x145   : > { %731 = vst.msk [vmem:[#allocation2 + $0x58] sm:$0xff] %vm719_vm1, %v714_v27 }
 0x148   : > { %v662_v31 = vpop.permute.xlu1 %661 }
 0x149   : > { %v706_v32 = vadd.f32 %v662_v31, %v546_v15 }
 0x14a   : > { %v684_v33 = vpop.permute.xlu0 %683 }
 0x14b   : > { %723 = vst.msk [vmem:[#allocation2 + $0x18] sm:$0xff] %vm719_vm1, %v706_v32  ;;  %v717_v35 = vadd.f32 %v684_v33, %v557_v23 }
 0x14d   : > { %734 = vst.msk [vmem:[#allocation2 + $0x70] sm:$0xff] %vm719_vm1, %v717_v35 }
 0x150   : > { %v686_v38 = vpop.permute.xlu1 %685 }
 0x151   : > { %v718_v39 = vadd.f32 %v686_v38, %v558_v37 }
 0x153   : > { %735 = vst.msk [vmem:[#allocation2 + $0x78] sm:$0xff] %vm719_vm1, %v718_v39 }
 0x154 PF: > { %v749_v25 = vld [vmem:[%s1706_s8 + $0x18] sm:$0xff]  ;;  %v748_v28 = vld [vmem:[%s1706_s8 + $0x10] sm:$0xff]  ;;  %s1976_s11 = sshll.u32 %s1529_s27, 6  ;;  %v747_v34 = vld [vmem:[%s1706_s8 + $0x8] sm:$0xff]  ;;  %s1557_s9 = smov 16   ;;  %vm754_vm2 = vcmask 261120  }
 0x155   : > { %791 = vmatpush.msra.mxu0 %v749_v25  ;;  %s1982_s23 = scalar_lea.vmem %s2219_s6, %s1976_s11  ;;  %s1988_s12 = scalar_lea.vmem %s1700_s21, %s1976_s11  ;;  %v746_v42 = vld [vmem:[%s1706_s8] sm:$0xff]  ;;  %vm942_vm3 = vcmask 130048   ;;  %v940_v13 = vld [vmem:[#allocation2 + $0x70] sm:$0xff]  ;;  %v939_v17 = vld [vmem:[#allocation2 + $0x68] sm:$0xff] }
 0x156   : > { %v832_v40 = vld [vmem:[%s1982_s23 + $0x10] sm:$0xff]  ;;  %v833_v41 = vld [vmem:[%s1982_s23 + $0x18] sm:$0xff]  ;;  %v738_v43 = vld [vmem:[%s1988_s12] sm:$0xff]  ;;  %s2025_s20 = scalar_lea.vmem %s2218_s5, %s1976_s11  ;;  %s1279_s15 = sshll.u32 %s1529_s27, 3 }
 0x157   : > { %792 = vmatpush.msra.mxu0 %v748_v28  ;;  %858 = vrot.lane.b32.xlu0 %v832_v40, %s1557_s9  ;;  %v835_v45 = vld [vmem:[%s1982_s23 + $0x28] sm:$0xff]  ;;  %v836_v47 = vld [vmem:[%s1982_s23 + $0x30] sm:$0xff]  ;;  %v830_v48 = vld [vmem:[%s1982_s23] sm:$0xff]  ;;  %s1280_s30 = sshll.u32 %s1533_s28, 4  ;;  %s1281_s13 = sshll.u32 %s1537_s29, 6 }
 0x158   : > { %860 = vrot.lane.b32.xlu1 %v833_v41, %s1557_s9  ;;  %v739_v46 = vld [vmem:[%s1988_s12 + $0x8] sm:$0xff]  ;;  %v740_v50 = vld [vmem:[%s1988_s12 + $0x10] sm:$0xff]  ;;  %v741_v51 = vld [vmem:[%s1988_s12 + $0x18] sm:$0xff]  ;;  %s1076_s10 = sadd.s32 %s1280_s30, %s1279_s15  ;;  %s1081_s27 = sshll.u32 %s1719_s18, 4  ;;  %s1082_s27 = int_to_ptr.vmem [resolvable:$true] %s1081_s27 }
 0x159   : > { %793 = vmatpush.msra.mxu0 %v747_v34  ;;  %v831_v49 = vld [vmem:[%s1982_s23 + $0x8] sm:$0xff]  ;;  %v834_v52 = vld [vmem:[%s1982_s23 + $0x20] sm:$0xff]  ;;  %v837_v55 = vld [vmem:[%s1982_s23 + $0x38] sm:$0xff]  ;;  %s1078_s17 = sadd.s32 %s1281_s13, %s1076_s10  ;;  %s2246_s29 = sand.u32 1, %s1521_s25  }
 0x15a   : > { %862 = vrot.lane.b32.xlu2 %v834_v52, %s1557_s9  ;;  %v742_v54 = vld [vmem:[%s1988_s12 + $0x20] sm:$0xff]  ;;  %v743_v56 = vld [vmem:[%s1988_s12 + $0x28] sm:$0xff]  ;;  %v744_v57 = vld [vmem:[%s1988_s12 + $0x30] sm:$0xff]  ;;  %s1282_s11 = sshll.u32 %s1078_s17, 3  ;;  %s1463_s19 = scalar_lea.hbm %s2220_s7, 1024 }
 0x15b   : > { %794 = vmatpush.msra.mxu0 %v746_v42  ;;  %v745_v58 = vld [vmem:[%s1988_s12 + $0x38] sm:$0xff]  ;;  %v2019_v59 = vld [vmem:[%s364_s24] ss:$0 sm:$0xff]  ;;  %v822_v53 = vld [vmem:[%s2025_s20 + $0x8] sm:$0xff]  ;;  %s1558_s24 = smov 112   ;;  %s1080_s23 = scalar_lea.hbm %s2220_s7, %s1282_s11 }
 0x15c   : > { %1246 = vmatmul.msk.f32.vlgmr.msra.gmra.mxu0 %vm754_vm2, %v738_v43  ;;  %v821_v62 = vld [vmem:[%s2025_s20] sm:$0xff]  ;;  %v823_v5 = vld [vmem:[%s2025_s20 + $0x10] sm:$0xff]  ;;  %v941_v10 = vld [vmem:[#allocation2 + $0x78] sm:$0xff]  ;;  %s1083_s28 = sshll.u32 %s1080_s23, 4  ;;  %s1065_s12 = scalar_lea.sflag [#allocation4], %s2246_s29  ;;  %s1084_s28 = int_to_ptr.hbm [resolvable:$true] %s1083_s28 }
 0x15d   : > { %1301 = vmatpush.xpose.msk.msra.mxu2 %vm942_vm3, %v941_v10  ;;  %1254 = vmatpush.xpose.msk.msrb.mxu0 %vm942_vm3, %v941_v10  ;;  %v824_v61 = vld [vmem:[%s2025_s20 + $0x18] sm:$0xff]  ;;  %v938_v20 = vld [vmem:[#allocation2 + $0x60] sm:$0xff]  ;;  %v936_v26 = vld [vmem:[#allocation2 + $0x50] sm:$0xff] }
 0x15e   : > { %1302 = vmatpush.xpose.msk.msra.mxu3 %vm942_vm3, %v941_v10  ;;  %1300 = vmatpush.xpose.msk.msra.mxu1 %vm942_vm3, %v941_v10  ;;  %v937_v6 = vld [vmem:[#allocation2 + $0x58] sm:$0xff]  ;;  %v825_v22 = vld [vmem:[%s2025_s20 + $0x20] sm:$0xff]  ;;  %v935_v29 = vld [vmem:[#allocation2 + $0x48] sm:$0xff] }
 0x15f   : > { %864 = vrot.lane.b32.xlu0 %v835_v45, %s1557_s9  ;;  %v826_v30 = vld [vmem:[%s2025_s20 + $0x28] sm:$0xff]  ;;  %v934_v33 = vld [vmem:[#allocation2 + $0x40] sm:$0xff]  ;;  %v933_v38 = vld [vmem:[#allocation2 + $0x38] sm:$0xff] }
 0x160   : > { %866 = vrot.lane.b32.xlu1 %v836_v47, %s1557_s9  ;;  %v827_v39 = vld [vmem:[%s2025_s20 + $0x30] sm:$0xff]  ;;  %v931_v47 = vld [vmem:[#allocation2 + $0x28] sm:$0xff] }
 0x161   : > { %1304 = vmatpush.xpose.msk.msra.mxu2 %vm942_vm3, %v940_v13  ;;  %1255 = vmatpush.xpose.msk.msrb.mxu0 %vm942_vm3, %v940_v13  ;;  %v932_v41 = vld [vmem:[#allocation2 + $0x30] sm:$0xff] }
 0x162   : > { %868 = vrot.lane.b32.xlu2 %v837_v55, %s1557_s9  ;;  %1305 = vmatpush.xpose.msk.msra.mxu3 %vm942_vm3, %v940_v13  ;;  %v930_v55 = vld [vmem:[#allocation2 + $0x20] sm:$0xff] }
 0x163   : > { %1303 = vmatpush.xpose.msk.msra.mxu1 %vm942_vm3, %v940_v13 }
 0x164   : > { %1247 = vmatmul.msk.f32.gmra.mxu0 %vm754_vm2, %v739_v46  ;;  %v828_v46 = vld [vmem:[%s2025_s20 + $0x38] sm:$0xff] }
 0x165   : > { %1307 = vmatpush.xpose.msk.msra.mxu2 %vm942_vm3, %v939_v17  ;;  %1256 = vmatpush.xpose.msk.msrb.mxu0 %vm942_vm3, %v939_v17 }
 0x166   : > { %1308 = vmatpush.xpose.msk.msra.mxu3 %vm942_vm3, %v939_v17 }
 0x167   : > { %854 = vrot.lane.b32.xlu0 %v830_v48, %s1557_s9  ;;  %1306 = vmatpush.xpose.msk.msra.mxu1 %vm942_vm3, %v939_v17 }
 0x168   : > { %856 = vrot.lane.b32.xlu1 %v831_v49, %s1557_s9  ;;  %s1457_s9 = sshra.s32 %s1084_s28, 4  ;;  %s1458_s9 = int_to_ptr.hbm [resolvable:$true] %s1457_s9 }
 0x169   : > { %1310 = vmatpush.xpose.msk.msra.mxu2 %vm942_vm3, %v938_v20  ;;  %1257 = vmatpush.xpose.msk.msrb.mxu0 %vm942_vm3, %v938_v20  ;;  %s1459_s8 = scalar_lea.hbm %s1458_s9, 64  ;;  %p1464_p6 = scmp.lt.s32.totalorder %s1458_s9, %s2220_s7 }
 0x16a   : > { %1311 = vmatpush.xpose.msk.msra.mxu3 %vm942_vm3, %v938_v20  ;;  %p1460_p2 = scmp.ne.s32.totalorder %s1458_s9, %s1459_s8  ;;  %p1465_p8 = scmp.lt.s32.totalorder %s1463_s19, %s1459_s8 }
 0x16b   : > { %1309 = vmatpush.xpose.msk.msra.mxu1 %vm942_vm3, %v938_v20 }
 0x16c   : > { %1248 = vmatmul.msk.f32.gmra.mxu0 %vm754_vm2, %v740_v50  ;;  %p1461_p3 = pnand %p1460_p2, %p1663_p5  ;;  %p1466_p9 = por %p1465_p8, %p1464_p6 }
 0x16d   : > { %1313 = vmatpush.xpose.msk.msra.mxu2 %vm942_vm3, %v937_v6  ;;  %1258 = vmatpush.xpose.msk.msrb.mxu0 %vm942_vm3, %v937_v6 }
 0x16e   : > { %1314 = vmatpush.xpose.msk.msra.mxu3 %vm942_vm3, %v937_v6  ;;  %p1462_p4 = pneg %p1461_p3 }
 0x16f   : > { %1312 = vmatpush.xpose.msk.msra.mxu1 %vm942_vm3, %v937_v6 }
 0x170   : > { %p1467_p10 = pnand %p1466_p9, %p1462_p4 }
 0x171   : > { %1316 = vmatpush.xpose.msk.msra.mxu2 %vm942_vm3, %v936_v26  ;;  %1259 = vmatpush.xpose.msk.msrb.mxu0 %vm942_vm3, %v936_v26 }
 0x172   : > { %1317 = vmatpush.xpose.msk.msra.mxu3 %vm942_vm3, %v936_v26 }
 0x173   : > { %1315 = vmatpush.xpose.msk.msra.mxu1 %vm942_vm3, %v936_v26 }
 0x174   : > { %1249 = vmatmul.msk.f32.gmra.mxu0 %vm754_vm2, %v741_v51 }
 0x175   : > { %1319 = vmatpush.xpose.msk.msra.mxu2 %vm942_vm3, %v935_v29  ;;  %1260 = vmatpush.xpose.msk.msrb.mxu0 %vm942_vm3, %v935_v29 }
 0x176   : > { %1320 = vmatpush.xpose.msk.msra.mxu3 %vm942_vm3, %v935_v29 }
 0x177   : > { %1318 = vmatpush.xpose.msk.msra.mxu1 %vm942_vm3, %v935_v29 }
 0x179   : > { %1322 = vmatpush.xpose.msk.msra.mxu2 %vm942_vm3, %v934_v33  ;;  %1261 = vmatpush.xpose.msk.msrb.mxu0 %vm942_vm3, %v934_v33 }
 0x17a   : > { %1323 = vmatpush.xpose.msk.msra.mxu3 %vm942_vm3, %v934_v33 }
 0x17b   : > { %1321 = vmatpush.xpose.msk.msra.mxu1 %vm942_vm3, %v934_v33 }
 0x17c   : > { %1250 = vmatmul.msk.f32.gmra.mxu0 %vm754_vm2, %v742_v54 }
 0x17d   : > { %1325 = vmatpush.xpose.msk.msra.mxu2 %vm942_vm3, %v933_v38  ;;  %1262 = vmatpush.xpose.msk.msrb.mxu0 %vm942_vm3, %v933_v38 }
 0x17e   : > { %1326 = vmatpush.xpose.msk.msra.mxu3 %vm942_vm3, %v933_v38 }
 0x17f   : > { %1324 = vmatpush.xpose.msk.msra.mxu1 %vm942_vm3, %v933_v38 }
 0x181   : > { %1328 = vmatpush.xpose.msk.msra.mxu2 %vm942_vm3, %v932_v41  ;;  %1263 = vmatpush.xpose.msk.msrb.mxu0 %vm942_vm3, %v932_v41 }
 0x182   : > { %1329 = vmatpush.xpose.msk.msra.mxu3 %vm942_vm3, %v932_v41 }
 0x183   : > { %1327 = vmatpush.xpose.msk.msra.mxu1 %vm942_vm3, %v932_v41 }
 0x184   : > { %1251 = vmatmul.msk.f32.gmra.mxu0 %vm754_vm2, %v743_v56  ;;  %v929_v56 = vld [vmem:[#allocation2 + $0x18] sm:$0xff] }
 0x185   : > { %1331 = vmatpush.xpose.msk.msra.mxu2 %vm942_vm3, %v931_v47  ;;  %1264 = vmatpush.xpose.msk.msrb.mxu0 %vm942_vm3, %v931_v47 }
 0x186   : > { %1332 = vmatpush.xpose.msk.msra.mxu3 %vm942_vm3, %v931_v47 }
 0x187   : > { %1330 = vmatpush.xpose.msk.msra.mxu1 %vm942_vm3, %v931_v47 }
 0x189   : > { %1334 = vmatpush.xpose.msk.msra.mxu2 %vm942_vm3, %v930_v55  ;;  %1265 = vmatpush.xpose.msk.msrb.mxu0 %vm942_vm3, %v930_v55 }
 0x18a   : > { %1335 = vmatpush.xpose.msk.msra.mxu3 %vm942_vm3, %v930_v55 }
 0x18b   : > { %1333 = vmatpush.xpose.msk.msra.mxu1 %vm942_vm3, %v930_v55 }
 0x18c   : > { %1252 = vmatmul.msk.f32.gmra.mxu0 %vm754_vm2, %v744_v57  ;;  %v928_v57 = vld [vmem:[#allocation2 + $0x10] sm:$0xff] }
 0x18d   : > { %1337 = vmatpush.xpose.msk.msra.mxu2 %vm942_vm3, %v929_v56  ;;  %1266 = vmatpush.xpose.msk.msrb.mxu0 %vm942_vm3, %v929_v56 }
 0x18e   : > { %1338 = vmatpush.xpose.msk.msra.mxu3 %vm942_vm3, %v929_v56 }
 0x18f   : > { %1336 = vmatpush.xpose.msk.msra.mxu1 %vm942_vm3, %v929_v56 }
 0x191   : > { %1340 = vmatpush.xpose.msk.msra.mxu2 %vm942_vm3, %v928_v57  ;;  %1267 = vmatpush.xpose.msk.msrb.mxu0 %vm942_vm3, %v928_v57 }
 0x192   : > { %1341 = vmatpush.xpose.msk.msra.mxu3 %vm942_vm3, %v928_v57 }
 0x193   : > { %1339 = vmatpush.xpose.msk.msra.mxu1 %vm942_vm3, %v928_v57 }
 0x194   : > { %1253 = vmatmul.msk.f32.gmra.mxu0 %vm754_vm2, %v745_v58  ;;  %v927_v58 = vld [vmem:[#allocation2 + $0x8] sm:$0xff] }
 0x195   : > { %1343 = vmatpush.xpose.msk.msra.mxu2 %vm942_vm3, %v927_v58  ;;  %1268 = vmatpush.xpose.msk.msrb.mxu0 %vm942_vm3, %v927_v58 }
 0x196   : > { %1344 = vmatpush.xpose.msk.msra.mxu3 %vm942_vm3, %v927_v58 }
 0x197   : > { %1342 = vmatpush.xpose.msk.msra.mxu1 %vm942_vm3, %v927_v58 }
 0x1b4   : > { %v863_v36 = vpop.permute.xlu2 %862 }
 0x1bc   : > { %v869_v45 = vpop.permute.xlu2 %868 }
 0x1c9   : > { %v859_v9 = vpop.permute.xlu0 %858 }
 0x1ca   : > { %v861_v16 = vpop.permute.xlu1 %860 }
 0x1d1   : > { %v865_v31 = vpop.permute.xlu0 %864 }
 0x1d2   : > { %v867_v35 = vpop.permute.xlu1 %866 }
 0x1d9   : > { %v796_v44 = vpop.f32.mrf.mxu0  ;;  %v855_v48 = vpop.permute.xlu0 %854 }
 0x1da   : > { %v2029_v63 = vadd.f32 %v2019_v59, %v796_v44  ;;  %v857_v42 = vpop.permute.xlu1 %856 }
 0x1dc   : > { %v2032_v0 = vmul.f32 %v821_v62, %v2029_v63  ;;  %v878_v54 = vmul.f32 %v855_v48, %v2029_v63 }
 0x1e1   : > { %v799_v1 = vpop.f32.mrf.mxu0 }
 0x1e2   : > { %v2036_v2 = vadd.f32 %v2019_v59, %v799_v1 }
 0x1e4   : > { %v2039_v3 = vmul.f32 %v822_v53, %v2036_v2  ;;  %v879_v50 = vmul.f32 %v857_v42, %v2036_v2 }
 0x1e9   : > { %v802_v4 = vpop.f32.mrf.mxu0 }
 0x1ea   : > { %v803_v8 = vadd.f32 %v2019_v59, %v802_v4 }
 0x1ec   : > { %v880_v11 = vmul.f32 %v859_v9, %v803_v8  ;;  %v2045_v12 = vmul.f32 %v823_v5, %v803_v8 }
 0x1ee   : > { %898 = vrot.lane.b32.xlu2 %v880_v11, %s1558_s24 }
 0x1f1   : > { %v805_v60 = vpop.f32.mrf.mxu0 }
 0x1f2   : > { %v806_v14 = vadd.f32 %v2019_v59, %v805_v60 }
 0x1f4   : > { %v881_v18 = vmul.f32 %v861_v16, %v806_v14  ;;  %v2058_v19 = vmul.f32 %v824_v61, %v806_v14 }
 0x1f6   : > { %900 = vrot.lane.b32.xlu1 %v881_v18, %s1558_s24 }
 0x1f9   : > { %v808_v21 = vpop.f32.mrf.mxu0 }
 0x1fa   : > { %v809_v24 = vadd.f32 %v2019_v59, %v808_v21 }
 0x1fc   : > { %v2071_v7 = vmul.f32 %v825_v22, %v809_v24  ;;  %v882_v28 = vmul.f32 %v863_v36, %v809_v24 }
 0x201   : > { %v811_v27 = vpop.f32.mrf.mxu0 }
 0x202   : > { %v812_v15 = vadd.f32 %v2019_v59, %v811_v27 }
 0x204   : > { %v883_v32 = vmul.f32 %v865_v31, %v812_v15  ;;  %v2083_v23 = vmul.f32 %v826_v30, %v812_v15 }
 0x206   : > { %904 = vrot.lane.b32.xlu0 %v883_v32, %s1558_s24 }
 0x209   : > { %v814_v37 = vpop.f32.mrf.mxu0 }
 0x20a   : > { %v815_v25 = vadd.f32 %v2019_v59, %v814_v37 }
 0x20c   : > { %v884_v34 = vmul.f32 %v867_v35, %v815_v25  ;;  %v2096_v40 = vmul.f32 %v827_v39, %v815_v25 }
 0x20e   : > { %902 = vrot.lane.b32.xlu0 %v882_v28, %s1558_s24  ;;  %906 = vrot.lane.b32.xlu2 %v884_v34, %s1558_s24 }
 0x211   : > { %v817_v43 = vpop.f32.mrf.mxu0 }
 0x212   : > { %v818_v49 = vadd.f32 %v2019_v59, %v817_v43  ;;  %v926_v59 = vld [vmem:[#allocation2] sm:$0xff] }
 0x213   : > { %1346 = vmatpush.xpose.msk.msra.mxu2 %vm942_vm3, %v926_v59  ;;  %1269 = vmatpush.xpose.msk.msrb.mxu0 %vm942_vm3, %v926_v59 }
 0x214   : > { %v885_v51 = vmul.f32 %v869_v45, %v818_v49  ;;  %v845_v52 = vmul.f32 %v828_v46, %v818_v49  ;;  %1347 = vmatpush.xpose.msk.msra.mxu3 %vm942_vm3, %v926_v59  ;;  %1345 = vmatpush.xpose.msk.msra.mxu1 %vm942_vm3, %v926_v59 }
 0x216   : > { %908 = vrot.lane.b32.xlu1 %v885_v51, %s1558_s24  ;;  %896 = vrot.lane.b32.xlu0 %v879_v50, %s1558_s24 }
 0x217   : > { %894 = vrot.lane.b32.xlu2 %v878_v54, %s1558_s24 }
 0x248   : > { %v899_v44 = vpop.permute.xlu2 %898 }
 0x249   : > { %v920_v62 = vadd.f32 %v899_v44, %v2045_v12 }
 0x24b   : > { %1272 = vmatmul.msk.f32.vlgmr.msra.gmra.mxu2 %vm942_vm3, %v920_v62 }
 0x268   : > { %v901_v63 = vpop.permute.xlu1 %900  ;;  %v907_v1 = vpop.permute.xlu2 %906 }
 0x269   : > { %v921_v53 = vadd.f32 %v901_v63, %v2058_v19  ;;  %v924_v10 = vadd.f32 %v907_v1, %v2096_v40 }
 0x26b   : > { %1273 = vmatmul.msk.f32.gmra.mxu2 %vm942_vm3, %v921_v53 }
 0x271   : > { %v895_v2 = vpop.permute.xlu2 %894 }
 0x272   : > { %v918_v4 = vadd.f32 %v895_v2, %v2032_v0 }
 0x274   : > { %1270 = vmatmul.msk.f32.vlgmr.msrb.gmra.mxu0 %vm942_vm3, %v918_v4 }
 0x278   : > { %v905_v5 = vpop.permute.xlu0 %904 }
 0x279   : > { %v923_v8 = vadd.f32 %v905_v5, %v2083_v23 }
 0x27b   : > { %1275 = vmatmul.msk.f32.vlgmr.msra.gmra.mxu3 %vm942_vm3, %v923_v8 }
 0x280   : > { %v903_v9 = vpop.permute.xlu0 %902 }
 0x281   : > { %v922_v11 = vadd.f32 %v903_v9, %v2071_v7 }
 0x283   : > { %1274 = vmatmul.msk.f32.gmra.mxu2 %vm942_vm3, %v922_v11  ;;  %1276 = vmatmul.msk.f32.gmra.mxu3 %vm942_vm3, %v924_v10 }
 0x288   : > { %v909_v0 = vpop.permute.xlu1 %908  ;;  %v897_v12 = vpop.permute.xlu0 %896 }
 0x289   : > { %v925_v13 = vadd.f32 %v909_v0, %v845_v52  ;;  %v919_v60 = vadd.f32 %v897_v12, %v2039_v3 }
 0x28b   : > { %1271 = vmatmul.msk.f32.vlgmr.msra.gmra.mxu1 %vm942_vm3, %v919_v60  ;;  %1277 = vmatmul.msk.f32.gmra.mxu3 %vm942_vm3, %v925_v13 }
 0x2ce   : > { %v1038_v61 = vpop.f32.mrf.mxu2 }
 0x2cf   : > { %1058 = vst [vmem:[%s1719_s18 + $0x10] sm:$0xff] %v1038_v61 }
 0x2ee   : > { %v1041_v14 = vpop.f32.mrf.mxu2 }
 0x2ef   : > { %1059 = vst [vmem:[%s1719_s18 + $0x18] sm:$0xff] %v1041_v14 }
 0x2f1   : > { %v1032_v16 = vpop.f32.mrf.mxu0 }
 0x2f2   : > { %1056 = vst [vmem:[%s1719_s18] sm:$0xff] %v1032_v16 }
 0x2fe   : > { %v1047_v17 = vpop.f32.mrf.mxu3 }
 0x2ff   : > { %1061 = vst [vmem:[%s1719_s18 + $0x28] sm:$0xff] %v1047_v17 }
 0x306   : > { %v1044_v3 = vpop.f32.mrf.mxu2  ;;  %v1050_v18 = vpop.f32.mrf.mxu3 }
 0x307   : > { %1060 = vst [vmem:[%s1719_s18 + $0x20] sm:$0xff] %v1044_v3 }
 0x308   : > { %1062 = vst [vmem:[%s1719_s18 + $0x30] sm:$0xff] %v1050_v18  ;;  %v1035_v19 = vpop.f32.mrf.mxu1 }
 0x309   : > { %1057 = vst [vmem:[%s1719_s18 + $0x8] sm:$0xff] %v1035_v19 }
 0x30e   : > { %v1053_v20 = vpop.f32.mrf.mxu3 }
 0x30f   : > { %1063 = vst [vmem:[%s1719_s18 + $0x38] sm:$0xff] %v1053_v20 }
 0x310   : > { %1470 = shalt.err (!%p1467_p10)
}
 0x311   : > { %s1559_s18 = smov 128   ;;  %s1560_s15 = smov 8  }
 0x312   : > { %1348 = dma.vmem_to_hbm [thread:$0]  (%p1663_p5), %s1082_s27, 1024, %s1084_s28, %s1065_s12, %s1559_s18, %s1559_s18, %s1560_s15  }
 0x313 PF: > { %s2247_s30 = sld [smem:[#allocation11_spill]] }
 0x314   : > { %s2248_s10 = sld [smem:[#allocation6_spill]] }
 0x319   : > { %p1354_p11 = scmp.ge.s32.totalorder %s2247_s30, 2 }
 0x31a   : > { %s1098_s17 = sand.u32 1, %s2248_s10  }
 0x31b   : > { %p1351_p12 = pnand %p1354_p11, %p1670_p7  ;;  %s1099_s11 = scalar_lea.sflag [#allocation4], %s1098_s17 }
 0x31d   : > { %p1352_p13 = pneg %p1351_p12 }
 0x31f   : > { %1512 = dma.done.wait (%p1352_p13), %s1099_s11, 1024  }
 0x320   : > { %1514 = vsyncadd (%p1352_p13), %s1099_s11, 4294966272  ;;  %s20_s10 = sadd.s32 1, %s2247_s30   ;;  %s2250_s14 = sld [smem:[#allocation7_spill]] }
 0x321   : > { %p17_p0 = scmp.ge.s32.totalorder %s20_s10, 18   ;;  %s2251_s26 = sld [smem:[#allocation16_spill]] }
 0x322   : > { %s2252_s27 = sld [smem:[#allocation8_spill]]  ;;  %s2258_s24 = smov %s1521_s25 }
 0x323   : > { %s2253_s28 = sld [smem:[#allocation9_spill]]  ;;  %19 = sbr.rel (!%p17_p0) target bundleno = 6 (0x6), region = 102 }
 0x324   : > { %s2254_s29 = sld [smem:[#allocation10_spill]] }
 0x325   : > { %s2255_s30 = sld [smem:[#allocation12_spill]] }
 0x326   : > { %s2256_s8 = sld [smem:[#allocation13_spill]]  ;;  %s2259_s25 = smov %s2250_s14 }
 0x327   : > { %s2257_s9 = sld [smem:[#allocation15_spill]] }
 0x328   :  { %1105 = vsyncpa [#allocation4], 1 }
 0x329   :  { %1107 = vsyncpa [#allocation4 + $0x1], 1 }

</bundles_post_ra>
